<compile_context>
chip_gen: v7x
topology: tpu7x:2x2x1
jax: 0.10.0
libtpu: 0.0.40
codegen_flags: <defaults>
</compile_context>

<pallas_src>
import jax
import jax.numpy as jnp
from jax.experimental import pallas as pl
from jax.experimental.pallas import tpu as pltpu


def attention_gate_kernel(g_ref, x_ref, wg_ref, wx_ref, b_ref, wpsi_ref,
                          bpsi_ref, out_ref):
    # g_ref: (Cg, TP), x_ref/out_ref: (Cx, TP) -- pixels along lanes.
    g = g_ref[...]                       # native dtype straight into the MXU
    x = x_ref[...]

    # g1 + x1 = Wg^T g + Wx^T x + (bg + bx)   (BN folded, biases pre-summed)
    h = jnp.dot(wg_ref[...], g, preferred_element_type=jnp.float32)
    h = h + jnp.dot(wx_ref[...], x, preferred_element_type=jnp.float32)
    h = jnp.maximum(h + b_ref[...], 0.0)                       # (F_int, TP) f32

    # psi 1x1 conv (single output channel).
    if wpsi_ref.shape[0] == 1:
        # Large F_int: (1, F_int) @ (F_int, TP) on the (otherwise idle) MXU.
        s = jnp.dot(wpsi_ref[...], h, preferred_element_type=jnp.float32)
    else:
        # Tiny F_int: lane-dense VPU multiply + sublane reduction.
        s = jnp.sum(h * wpsi_ref[...], axis=0, keepdims=True)
    psi = jax.nn.sigmoid(s + bpsi_ref[0, 0])                   # (1, TP) f32

    out_ref[...] = (x * psi).astype(out_ref.dtype)             # sublane bcast


def _fold_bn(w, b, gamma, beta, mean, var, eps=1e-5):
    """Fold eval-mode BatchNorm into a (Cin, Cout) weight and (Cout,) bias."""
    scale = gamma / jnp.sqrt(var + eps)
    return w * scale[None, :], (b - mean) * scale + beta


def _round_up(x, m):
    return ((x + m - 1) // m) * m


def _vmem_capacity_bytes():
    """Physical VMEM of the current TPU generation (fallback: 128 MiB)."""
    try:
        return int(pltpu.get_tpu_info().vmem_capacity_bytes)
    except Exception:
        return 128 * 1024 * 1024


def _choose_tile_hw(HW, N, Cg, Cx, Fint, itemsize, vmem_budget_bytes):
    """Largest lane tile (multiple of 128) fitting a generation-aware budget."""
    cg = _round_up(Cg, 8)                 # sublane padding of activation blocks
    cx = _round_up(Cx, 8)
    fi = _round_up(Fint, 8)
    # Resident weight/bias blocks (lane-padded to 128), double-buffered.
    fixed = 2 * (fi * (_round_up(Cg, 128) + _round_up(Cx, 128)) + 2 * fi * 128) * 4
    # Per-pixel bytes: double-buffered g/x/out I/O blocks (native dtype) plus
    # f32 intermediates (h, promoted x*psi, psi row).
    per_pixel = 2 * (cg + 2 * cx) * itemsize + (fi + cx + 16) * 4
    avail = max(vmem_budget_bytes - fixed, per_pixel * 128)
    tile = avail // per_pixel
    tile = max(128, min(int(tile), 32768))
    tile = (tile // 128) * 128
    tile = min(tile, _round_up(HW, 128))   # never exceed the (rounded) extent
    # v7x megacore: make sure the parallel grid has >= 2 steps for the 2 TCs.
    while N * pl.cdiv(HW, tile) < 2 and tile > 128:
        tile = max(128, (tile // 2 // 128) * 128)
    return tile


@jax.jit
def attention_gate(g_nchw, x_nchw, params):
    N, Cg, H, W = g_nchw.shape
    _, Cx, _, _ = x_nchw.shape
    HW = H * W

    # Free reshapes: kernel reads NCHW natively (channels on sublanes,
    # pixels on lanes).  No transposes, no padding, no output slice.
    g3 = g_nchw.reshape(N, Cg, HW)
    x3 = x_nchw.reshape(N, Cx, HW)
    act_dtype = x3.dtype

    # Fold eval-mode BN into the 1x1 conv weights / biases.
    wg, bg = _fold_bn(params["wg"], params["bg"], params["gamma_g"],
                      params["beta_g"], params["mean_g"], params["var_g"])
    wx, bx = _fold_bn(params["wx"], params["bx"], params["gamma_x"],
                      params["beta_x"], params["mean_x"], params["var_x"])
    wpsi, bpsi = _fold_bn(params["wpsi"], params["bpsi"], params["gamma_p"],
                          params["beta_p"], params["mean_p"], params["var_p"])
    Fint = wg.shape[1]

    # Projection weights in the activation dtype (bf16 stays bf16 on the MXU);
    # post-matmul biases stay f32 (added to the f32 accumulator).
    wg_t = wg.T.astype(act_dtype)                       # (F_int, Cg)
    wx_t = wx.T.astype(act_dtype)                       # (F_int, Cx)
    b_col = (bg + bx).reshape(Fint, 1).astype(jnp.float32)
    bpsi_s = bpsi.reshape(1, 1).astype(jnp.float32)     # scalar -> SMEM
    # psi projection form: MXU row-dot at production F_int, VPU reduce otherwise.
    psi_on_mxu = Fint >= 64
    wpsi_blk = (wpsi.reshape(1, Fint) if psi_on_mxu
                else wpsi.reshape(Fint, 1)).astype(jnp.float32)

    # Generation-aware VMEM budget / limit.
    cap = _vmem_capacity_bytes()
    tile_budget = min(int(cap * 0.30), 48 * 1024 * 1024)
    vmem_limit = min(cap // 2, 48 * 1024 * 1024)

    tile_hw = _choose_tile_hw(HW, N, Cg, Cx, Fint,
                              jnp.dtype(act_dtype).itemsize, tile_budget)
    grid = (N, pl.cdiv(HW, tile_hw))     # ragged last block handled by Pallas

    out3 = pl.pallas_call(
        attention_gate_kernel,
        out_shape=jax.ShapeDtypeStruct((N, Cx, HW), act_dtype),
        grid_spec=pltpu.PrefetchScalarGridSpec(
            num_scalar_prefetch=0,
            grid=grid,
            in_specs=[
                pl.BlockSpec((None, Cg, tile_hw), lambda n, t: (n, 0, t)),
                pl.BlockSpec((None, Cx, tile_hw), lambda n, t: (n, 0, t)),
                pl.BlockSpec((Fint, Cg), lambda n, t: (0, 0)),
                pl.BlockSpec((Fint, Cx), lambda n, t: (0, 0)),
                pl.BlockSpec((Fint, 1), lambda n, t: (0, 0)),
                pl.BlockSpec(wpsi_blk.shape, lambda n, t: (0, 0)),
                pl.BlockSpec(memory_space=pltpu.MemorySpace.SMEM),  # psi bias
            ],
            out_specs=pl.BlockSpec((None, Cx, tile_hw), lambda n, t: (n, 0, t)),
        ),
        compiler_params=pltpu.CompilerParams(
            dimension_semantics=("parallel", "parallel"),
            vmem_limit_bytes=vmem_limit),
    )(g3, x3, wg_t, wx_t, b_col, wpsi_blk, bpsi_s)

    return out3.reshape(N, Cx, H, W)


def _reference(g_nchw, x_nchw, params):
    """Pure-JAX reference matching the PyTorch forward (eval-mode BN)."""
    wg, bg = _fold_bn(params["wg"], params["bg"], params["gamma_g"],
                      params["beta_g"], params["mean_g"], params["var_g"])
    wx, bx = _fold_bn(params["wx"], params["bx"], params["gamma_x"],
                      params["beta_x"], params["mean_x"], params["var_x"])
    wpsi, bpsi = _fold_bn(params["wpsi"], params["bpsi"], params["gamma_p"],
                          params["beta_p"], params["mean_p"], params["var_p"])
    g = jnp.transpose(g_nchw, (0, 2, 3, 1))
    x = jnp.transpose(x_nchw, (0, 2, 3, 1))
    g1 = g @ wg + bg
    x1 = x @ wx + bx
    h = jnp.maximum(g1 + x1, 0.0)
    psi = jax.nn.sigmoid(h @ wpsi + bpsi)
    out = x * psi
    return jnp.transpose(out, (0, 3, 1, 2))


def _make_params(key, F_g, F_l, F_int):
    ks = jax.random.split(key, 6)
    return {
        # 1x1 conv weights stored as (Cin, Cout); PyTorch stores (Cout, Cin, 1, 1).
        "wg": jax.random.normal(ks[0], (F_g, F_int), jnp.float32) * 0.2,
        "bg": jax.random.normal(ks[1], (F_int,), jnp.float32) * 0.1,
        "wx": jax.random.normal(ks[2], (F_l, F_int), jnp.float32) * 0.2,
        "bx": jax.random.normal(ks[3], (F_int,), jnp.float32) * 0.1,
        "wpsi": jax.random.normal(ks[4], (F_int, 1), jnp.float32) * 0.2,
        "bpsi": jax.random.normal(ks[5], (1,), jnp.float32) * 0.1,
        # BatchNorm (eval-mode) params / running stats, deterministic synthetic.
        "gamma_g": jnp.linspace(0.9, 1.1, F_int, dtype=jnp.float32),
        "beta_g": jnp.linspace(-0.05, 0.05, F_int, dtype=jnp.float32),
        "mean_g": jnp.linspace(-0.1, 0.1, F_int, dtype=jnp.float32),
        "var_g": jnp.linspace(0.8, 1.2, F_int, dtype=jnp.float32),
        "gamma_x": jnp.linspace(1.1, 0.9, F_int, dtype=jnp.float32),
        "beta_x": jnp.linspace(0.05, -0.05, F_int, dtype=jnp.float32),
        "mean_x": jnp.linspace(0.1, -0.1, F_int, dtype=jnp.float32),
        "var_x": jnp.linspace(1.2, 0.8, F_int, dtype=jnp.float32),
        "gamma_p": jnp.array([1.05], jnp.float32),
        "beta_p": jnp.array([0.02], jnp.float32),
        "mean_p": jnp.array([0.03], jnp.float32),
        "var_p": jnp.array([0.9], jnp.float32),
    }


def _run_case(N, F_g, F_l, F_int, H, W, key):
    kg, kx, kp = jax.random.split(key, 3)
    g = jax.random.normal(kg, (N, F_g, H, W), jnp.float32)
    x = jax.random.normal(kx, (N, F_l, H, W), jnp.float32)
    params = _make_params(kp, F_g, F_l, F_int)

    out = jax.block_until_ready(attention_gate(g, x, params))
    ref = _reference(g, x, params)
    assert out.shape == (N, F_l, H, W)
    assert jnp.allclose(out, ref, atol=1e-5, rtol=1e-5), "mismatch vs reference"


if __name__ == "__main__":
    key = jax.random.PRNGKey(0)
    k1, k2 = jax.random.split(key)
    # Small shapes consistent with the module: F_g = F_l = 4, F_int = 8.
    _run_case(2, 4, 4, 8, 16, 16, k1)   # H*W divisible by the lane tile
    _run_case(2, 4, 4, 8, 9, 9, k2)     # ragged last lane block (no host pad)
    print("KERNEL_OK")
</pallas_src>

<mosaic_0001>
module attributes {stable_mosaic.version = 11 : i64} {
  func.func @attention_gate_kernel(%arg0: i32, %arg1: i32, %arg2: memref<1x4x256xf32, #tpu.memory_space<vmem>>, %arg3: memref<1x4x256xf32, #tpu.memory_space<vmem>>, %arg4: memref<8x4xf32, #tpu.memory_space<vmem>>, %arg5: memref<8x4xf32, #tpu.memory_space<vmem>>, %arg6: memref<8x1xf32, #tpu.memory_space<vmem>>, %arg7: memref<8x1xf32, #tpu.memory_space<vmem>>, %arg8: memref<1x1xf32, #tpu.memory_space<smem>>, %arg9: memref<1x4x256xf32, #tpu.memory_space<vmem>>) attributes {dimension_semantics = [#tpu.dimension_semantics<parallel>, #tpu.dimension_semantics<parallel>], iteration_bounds = array<i64: 2, 1>, scalar_prefetch = 0 : i64, scratch_operands = 0 : i64, tpu.core_type = #tpu.core_type<tc>, window_params = [{transform_indices = @transform_0, window_bounds = array<i64: 1, 4, 256>}, {transform_indices = @transform_1, window_bounds = array<i64: 1, 4, 256>}, {pipeline_mode = #tpu.pipeline_mode<synchronous>, transform_indices = @transform_2, window_bounds = array<i64: 8, 4>}, {pipeline_mode = #tpu.pipeline_mode<synchronous>, transform_indices = @transform_3, window_bounds = array<i64: 8, 4>}, {pipeline_mode = #tpu.pipeline_mode<synchronous>, transform_indices = @transform_4, window_bounds = array<i64: 8, 1>}, {pipeline_mode = #tpu.pipeline_mode<synchronous>, transform_indices = @transform_5, window_bounds = array<i64: 8, 1>}, {transform_indices = @transform_6, window_bounds = array<i64: 1, 1>}, {transform_indices = @transform_7, window_bounds = array<i64: 1, 4, 256>}]} {
    %c0 = arith.constant 0 : index
    %c0_0 = arith.constant 0 : index
    %c0_1 = arith.constant 0 : index
    %0 = vector.load %arg2[%c0, %c0_0, %c0_1] : memref<1x4x256xf32, #tpu.memory_space<vmem>>, vector<1x4x256xf32>
    %1 = vector.shape_cast %0 : vector<1x4x256xf32> to vector<4x256xf32>
    %c0_2 = arith.constant 0 : index
    %c0_3 = arith.constant 0 : index
    %c0_4 = arith.constant 0 : index
    %2 = vector.load %arg3[%c0_2, %c0_3, %c0_4] : memref<1x4x256xf32, #tpu.memory_space<vmem>>, vector<1x4x256xf32>
    %3 = vector.shape_cast %2 : vector<1x4x256xf32> to vector<4x256xf32>
    %c0_5 = arith.constant 0 : index
    %c0_6 = arith.constant 0 : index
    %4 = vector.load %arg4[%c0_5, %c0_6] : memref<8x4xf32, #tpu.memory_space<vmem>>, vector<8x4xf32>
    %cst = arith.constant dense<0.000000e+00> : vector<8x256xf32>
    %5 = tpu.matmul %4, %1, %cst {dimension_numbers = #tpu.dot_dimension_numbers<[1], [0], [0], [1], [0, 0, 1, 1], [], []>} : vector<8x4xf32>, vector<4x256xf32>, vector<8x256xf32> -> vector<8x256xf32>
    %c0_7 = arith.constant 0 : index
    %c0_8 = arith.constant 0 : index
    %6 = vector.load %arg5[%c0_7, %c0_8] : memref<8x4xf32, #tpu.memory_space<vmem>>, vector<8x4xf32>
    %cst_9 = arith.constant dense<0.000000e+00> : vector<8x256xf32>
    %7 = tpu.matmul %6, %3, %cst_9 {dimension_numbers = #tpu.dot_dimension_numbers<[1], [0], [0], [1], [0, 0, 1, 1], [], []>} : vector<8x4xf32>, vector<4x256xf32>, vector<8x256xf32> -> vector<8x256xf32>
    %8 = arith.addf %5, %7 : vector<8x256xf32>
    %c0_10 = arith.constant 0 : index
    %c0_11 = arith.constant 0 : index
    %9 = vector.load %arg6[%c0_10, %c0_11] : memref<8x1xf32, #tpu.memory_space<vmem>>, vector<8x1xf32>
    %10 = vector.broadcast %9 : vector<8x1xf32> to vector<8x256xf32>
    %11 = arith.addf %8, %10 : vector<8x256xf32>
    %cst_12 = arith.constant 0.000000e+00 : f32
    %12 = vector.broadcast %cst_12 : f32 to vector<8x256xf32>
    %13 = arith.maximumf %11, %12 : vector<8x256xf32>
    %c0_13 = arith.constant 0 : index
    %c0_14 = arith.constant 0 : index
    %14 = vector.load %arg7[%c0_13, %c0_14] : memref<8x1xf32, #tpu.memory_space<vmem>>, vector<8x1xf32>
    %15 = vector.broadcast %14 : vector<8x1xf32> to vector<8x256xf32>
    %16 = arith.mulf %13, %15 : vector<8x256xf32>
    %cst_15 = arith.constant dense<0.000000e+00> : vector<256xf32>
    %17 = vector.multi_reduction <add>, %16, %cst_15 [0] : vector<8x256xf32> to vector<256xf32>
    %18 = vector.shape_cast %17 : vector<256xf32> to vector<1x256xf32>
    %c0_16 = arith.constant 0 : index
    %c0_17 = arith.constant 0 : index
    %19 = memref.load %arg8[%c0_16, %c0_17] : memref<1x1xf32, #tpu.memory_space<smem>>
    %20 = vector.broadcast %19 : f32 to vector<1x256xf32>
    %21 = arith.addf %18, %20 : vector<1x256xf32>
    %22 = arith.negf %21 : vector<1x256xf32>
    %23 = math.exp %22 : vector<1x256xf32>
    %cst_18 = arith.constant 1.000000e+00 : f32
    %24 = vector.broadcast %cst_18 : f32 to vector<1x256xf32>
    %25 = arith.addf %24, %23 : vector<1x256xf32>
    %26 = arith.divf %24, %25 : vector<1x256xf32>
    %27 = vector.broadcast %26 : vector<1x256xf32> to vector<4x256xf32>
    %28 = arith.mulf %3, %27 : vector<4x256xf32>
    %c0_19 = arith.constant 0 : index
    %c0_20 = arith.constant 0 : index
    %c0_21 = arith.constant 0 : index
    %29 = vector.load %arg9[%c0_19, %c0_20, %c0_21] : memref<1x4x256xf32, #tpu.memory_space<vmem>>, vector<1x4x256xf32>
    %30 = vector.shape_cast %29 : vector<1x4x256xf32> to vector<4x256xf32>
    %31 = vector.shape_cast %28 : vector<4x256xf32> to vector<1x4x256xf32>
    tpu.vector_store %arg9[%c0_19, %c0_20, %c0_21], %31 {strides = array<i32>} : memref<1x4x256xf32, #tpu.memory_space<vmem>>, vector<1x4x256xf32>,
    return
  }
  func.func @transform_0(%arg0: i32, %arg1: i32) -> (i32, i32, i32) {
    %c0_i32 = arith.constant 0 : i32
    %c0_i32_0 = arith.constant 0 : i32
    return %arg0, %c0_i32, %arg1 : i32, i32, i32
  }
  func.func @transform_1(%arg0: i32, %arg1: i32) -> (i32, i32, i32) {
    %c0_i32 = arith.constant 0 : i32
    %c0_i32_0 = arith.constant 0 : i32
    return %arg0, %c0_i32, %arg1 : i32, i32, i32
  }
  func.func @transform_2(%arg0: i32, %arg1: i32) -> (i32, i32) {
    %c0_i32 = arith.constant 0 : i32
    %c0_i32_0 = arith.constant 0 : i32
    %c0_i32_1 = arith.constant 0 : i32
    return %c0_i32, %c0_i32_0 : i32, i32
  }
  func.func @transform_3(%arg0: i32, %arg1: i32) -> (i32, i32) {
    %c0_i32 = arith.constant 0 : i32
    %c0_i32_0 = arith.constant 0 : i32
    %c0_i32_1 = arith.constant 0 : i32
    return %c0_i32, %c0_i32_0 : i32, i32
  }
  func.func @transform_4(%arg0: i32, %arg1: i32) -> (i32, i32) {
    %c0_i32 = arith.constant 0 : i32
    %c0_i32_0 = arith.constant 0 : i32
    %c0_i32_1 = arith.constant 0 : i32
    return %c0_i32, %c0_i32_0 : i32, i32
  }
  func.func @transform_5(%arg0: i32, %arg1: i32) -> (i32, i32) {
    %c0_i32 = arith.constant 0 : i32
    %c0_i32_0 = arith.constant 0 : i32
    %c0_i32_1 = arith.constant 0 : i32
    return %c0_i32, %c0_i32_0 : i32, i32
  }
  func.func @transform_6(%arg0: i32, %arg1: i32) -> (i32, i32) {
    %c0_i32 = arith.constant 0 : i32
    %c0_i32_0 = arith.constant 0 : i32
    %c0_i32_1 = arith.constant 0 : i32
    return %c0_i32, %c0_i32_0 : i32, i32
  }
  func.func @transform_7(%arg0: i32, %arg1: i32) -> (i32, i32, i32) {
    %c0_i32 = arith.constant 0 : i32
    %c0_i32_0 = arith.constant 0 : i32
    return %arg0, %c0_i32, %arg1 : i32, i32, i32
  }
}

</mosaic_0001>

<bundles_post_ra>
// kernel: attention_gate.1
= control target key start
LH: loop header
LB: loop body
LE: loop exit
PB: predicated region body
PF: predicated region fallthrough
CT: control target
= control target key end

     0   :  { %s810_s26 = smov 0   ;;  %s812_s27 = smov 0   ;;  %s863_s0 = inlined_call_operand.vmem [shape: f32[2,4,256], index: 0, kind: input, shape index: {}]   ;;  %s864_s1 = inlined_call_operand.vmem [shape: f32[2,4,256], index: 1, kind: input, shape index: {}]   ;;  %s865_s2 = inlined_call_operand.vmem [shape: f32[8,4], index: 2, kind: input, shape index: {}]   ;;  %s866_s3 = inlined_call_operand.vmem [shape: f32[8,4], index: 3, kind: input, shape index: {}]   ;;  %s867_s4 = inlined_call_operand.vmem [shape: f32[8,1], index: 4, kind: input, shape index: {}]   ;;  %s868_s5 = inlined_call_operand.vmem [shape: f32[8,1], index: 5, kind: input, shape index: {}]   ;;  %s869_s6 = inlined_call_operand.<no memory space> [shape: f32[1,1], index: 6, kind: input, shape index: {}]   ;;  %s870_s7 = inlined_call_operand.vmem [shape: f32[2,4,256], index: 7, kind: output, shape index: {}]  }
   0x1   :  { %12 = sst [smem:[#allocation2]] %s869_s6  ;;  %s814_s28 = smov 0  }
   0x2 LB: > { %s30_s6 = sadd.s32 1, %s759_s27  ;;  %p682_p0 = scmp.ge.s32.totalorder %s763_s28, 1  ;;  %s763_s28 = sphi %s814_s28, %s18_s28   ;;  %s759_s27 = sphi %s812_s27, %s872_s27   ;;  %s755_s26 = sphi %s810_s26, %s871_s26  }
   0x3   : > { %p32_p1 = scmp.ge.s32.totalorder %s30_s6, 2  ;;  %p276_p2 = scmp.lt.s32.totalorder %s763_s28, 3 }
   0x5   : > { %s874_s6 = smov (%p32_p1, %s30_s6), 0  ;;  %p277_p3 = pnand %p682_p0, %p276_p2 }
   0x6   : > { %p326_p4 = scmp.lt.s32.totalorder (!%p277_p3), %s755_s26, 1  ;;  %v765_v0 = vmov (!%p277_p3), 0.0   ;;  %v521_v1 = vld [vmem:[%s867_s4] sm:$0xff] (!%p277_p3)  ;;  %v766_v2 = vmov (!%p277_p3), 0   ;;  %vm365_vm0 = vcmask (!%p277_p3), 1043456   ;;  %vm361_vm1 = vcmask (!%p277_p3), 31744  }
   0x7   : > { %280 = sbr.rel (%p277_p3) target bundleno = 289 (0x121), region = 48  ;;  %434 = vmatprep.mubr.f32.mxu1 (!%p277_p3), %v765_v0  ;;  %514 = vmatprep.mubr.f32.mxu0 (!%p277_p3), %v765_v0  ;;  %v531_v3 = vld [vmem:[%s868_s5] sm:$0xff] (!%p277_p3)  ;;  %s551_s21 = sld [smem:[#allocation2]] (!%p277_p3) }
   0x8   : > { %730 = vset.pattern.permute.xlu0 (!%p277_p3), %v766_v2  ;;  %v358_v8 = vld [vmem:[%s866_s3] sm:$0xff] (!%p277_p3) }
   0x9   : > { %524 = vperm.xlu0 (!%p277_p3), %730, %v521_v1   ;;  %v357_v9 = vld [vmem:[%s865_s2] sm:$0xff] (!%p277_p3) }
   0xd   : > { %534 = vperm.xlu0 (!%p277_p3), %730, %v531_v3   ;;  %v552_v33 = vstv (!%p277_p3), %s551_s21 }
   0xe   : > { %s876_s26 = smov (!%p326_p4, %s755_s26), 1 }
   0xf   : > { %s831_s8 = sshll.u32 %s876_s26, 3 }
  0x10   : > { %s343_s13 = scalar_lea.vmem %s864_s1, %s831_s8  ;;  %s333_s16 = scalar_lea.vmem %s863_s0, %s831_s8 }
  0x11   : > { %v356_v4 = vld [vmem:[%s343_s13] sm:$0xff]  ;;  %s353_s24 = scalar_lea.vmem %s870_s7, %s831_s8 }
  0x12   : > { %v360_v5 = vcombine.high %v356_v4, %v356_v4  ;;  %v355_v6 = vld [vmem:[%s333_s16] sm:$0xff] }
  0x13   : > { %v442_v7 = vcombine.high %v355_v6, %v355_v6 }
  0x14   : > { %689 = vmatprep.subr.msk.mxu1 %vm365_vm0, %v360_v5 }
  0x15   : > { %692 = vmatprep.subr.msk.mxu0 %vm365_vm0, %v442_v7  ;;  %690 = vmatpush1.msk.msra.mxu1 %vm365_vm0, %v356_v4 }
  0x16   : > { %693 = vmatpush1.msk.msra.mxu0 %vm365_vm0, %v355_v6  ;;  %691 = vmatmul.mubr.msk.f32.vlgmr.msra.gmra.mrb[0].mxu1 %vm361_vm1, %v358_v8 }
  0x17   : > { %694 = vmatmul.mubr.msk.f32.vlgmr.msra.gmra.mrb[0].mxu0 %vm361_vm1, %v357_v9 }
  0x88   : > { %v525_v10 = vpop.permute.xlu0 %524 }
  0x8c   : > { %v535_v20 = vpop.permute.xlu0 %534 }
  0xe9   : > { %v436_v11 = vpop.f32.mrb[0].mxu1 }
  0xea   : > { %v516_v12 = vpop.f32.mrb[0].mxu0  ;;  %v438_v13 = vpop.f32.mrb[1].mxu1 }
  0xeb   : > { %v517_v14 = vadd.f32 %v516_v12, %v436_v11  ;;  %v518_v15 = vpop.f32.mrb[1].mxu0 }
  0xec   : > { %v519_v16 = vadd.f32 %v518_v15, %v438_v13 }
  0xed   : > { %v527_v17 = vadd.f32 %v525_v10, %v517_v14 }
  0xee   : > { %v528_v18 = vadd.f32 %v525_v10, %v519_v16 }
  0xef   : > { %v529_v19 = vmax.f32 %v527_v17, 0.0 }
  0xf0   : > { %v530_v21 = vmax.f32 %v528_v18, 0.0 }
  0xf1   : > { %v537_v22 = vmul.f32 %v535_v20, %v529_v19 }
  0xf2   : > { %v538_v23 = vmul.f32 %v535_v20, %v530_v21 }
  0xf3   : > { %v539_v24 = vrot.slane %v537_v22, 4 }
  0xf4   : > { %v545_v25 = vrot.slane %v538_v23, 4 }
  0xf5   : > { %v540_v26 = vadd.f32 %v539_v24, %v537_v22 }
  0xf6   : > { %v546_v27 = vadd.f32 %v545_v25, %v538_v23 }
  0xf7   : > { %v541_v28 = vrot.slane %v540_v26, 2 }
  0xf8   : > { %v547_v29 = vrot.slane %v546_v27, 2 }
  0xf9   : > { %v542_v30 = vadd.f32 %v541_v28, %v540_v26 }
  0xfa   : > { %v548_v31 = vadd.f32 %v547_v29, %v546_v27 }
  0xfb   : > { %v543_v32 = vrot.slane %v542_v30, 1 }
  0xfc   : > { %v549_v34 = vrot.slane %v548_v31, 1 }
  0xfd   : > { %v544_v35 = vadd.f32 %v543_v32, %v542_v30 }
  0xfe   : > { %v550_v36 = vadd.f32 %v549_v34, %v548_v31 }
  0xff   : > { %v553_v37 = vadd.f32 %v552_v33, %v544_v35 }
 0x100   : > { %v554_v38 = vadd.f32 %v552_v33, %v550_v36 }
 0x101   : > { %v695_v39 = vmul.f32 -1.442695, %v553_v37 }
 0x102   : > { %v696_v40 = vmul.f32 -1.442695, %v554_v38 }
 0x103   : > { %733 = vpow2.f32 %v695_v39 }
 0x104   : > { %735 = vpow2.f32 %v696_v40 }
 0x10d   : > { %v734_v41 = vpop.eup %733 }
 0x10e   : > { %v736_v42 = vpop.eup %735  ;;  %v561_v43 = vadd.f32 1.0, %v734_v41 }
 0x10f   : > { %v562_v44 = vadd.f32 1.0, %v736_v42 }
 0x110   : > { %737 = vrcp.f32 %v561_v43 }
 0x111   : > { %739 = vrcp.f32 %v562_v44 }
 0x11a   : > { %v738_v45 = vpop.eup %737 }
 0x11b   : > { %v740_v46 = vpop.eup %739 }
 0x11c   : > { %v569_v47 = vcombine.low %v738_v45, %v740_v46 }
 0x11e   : > { %v571_v48 = vmul.f32 %v569_v47, %v356_v4 }
 0x120   : > { %572 = vst [vmem:[%s353_s24] sm:$0xff] %v571_v48 }
 0x121 PF: > { %s18_s28 = sadd.s32 1, %s763_s28   ;;  %s871_s26 = smov %s759_s27 }
 0x122   : > { %p15_p5 = scmp.ge.s32.totalorder %s18_s28, 4   ;;  %s872_s27 = smov %s874_s6 }
 0x124   :  { %17 = sbr.rel (!%p15_p5) target bundleno = 2 (0x2), region = 81 }

</bundles_post_ra>
